<compile_context>
chip_gen: v5e
topology: v5e:2x2
jax: 0.10.0
libtpu: 0.0.40
codegen_flags: <defaults>
</compile_context>

<pallas_src>
import functools

import jax
import jax.numpy as jnp
from jax import lax
from jax.experimental import pallas as pl
from jax.experimental.pallas import tpu as pltpu

LANES = 128


def _min_sublane(dtype) -> int:
    # Minimum second-to-last tile dim per dtype width (f32:8, bf16:16, int8:32).
    return {4: 8, 2: 16, 1: 32}.get(jnp.dtype(dtype).itemsize, 8)


def _partials_kernel(yhat_ref, y_ref, out_ref, *, beta, eta,
                     tile_rows, n_valid, mask_needed):
    yhat = yhat_ref[...].astype(jnp.float32)
    y = y_ref[...].astype(jnp.float32)

    z = beta * (yhat + eta)
    # sigmoid(z) == 0.5 * (tanh(z / 2) + 1): a single EUP transcendental.
    sig = 0.5 * (jnp.tanh(0.5 * z) + 1.0)

    if mask_needed:
        # Mask the lane-pad tail and the out-of-range rows of the (partial)
        # last block.  Valid for inputs up to 2^31 elements (int32 indices).
        i = pl.program_id(0)
        row = lax.broadcasted_iota(jnp.int32, (tile_rows, LANES), 0)
        lane = lax.broadcasted_iota(jnp.int32, (tile_rows, LANES), 1)
        elem = (i * tile_rows + row) * LANES + lane      # flat element index
        valid = elem < n_valid
        sig = jnp.where(valid, sig, 0.0)
        y = jnp.where(valid, y, 0.0)

    # Lane-wide partial sums: axis-0 reduce is vreg+vreg VPU adds plus one
    # small sublane reduce per quantity; the cross-lane reduce happens once,
    # in the epilogue outside the kernel.
    out_ref[0, 0:1, :] = jnp.sum(sig, axis=0, keepdims=True)
    out_ref[0, 1:2, :] = jnp.sum(y, axis=0, keepdims=True)
    out_ref[0, 2:3, :] = jnp.sum(sig * y, axis=0, keepdims=True)


def global_sigmoid_f1(y_hat: jax.Array, y: jax.Array,
                      beta: float = 1.0, eta: float = 0.0) -> jax.Array:
    """Pallas implementation of GlobalSigmoidF1.forward. Returns a scalar f32."""
    assert y_hat.shape == y.shape

    # Bool refs are awkward in Mosaic; widen to int8 (same byte count).
    if y_hat.dtype == jnp.bool_:
        y_hat = y_hat.astype(jnp.int8)
    if y.dtype == jnp.bool_:
        y = y.astype(jnp.int8)

    yhat_flat = y_hat.reshape(-1)        # reshape of a contiguous array: free
    y_flat = y.reshape(-1)
    n = yhat_flat.shape[0]

    align = max(_min_sublane(yhat_flat.dtype), _min_sublane(y_flat.dtype))
    chunk = align * LANES
    padded = ((n + chunk - 1) // chunk) * chunk
    if padded != n:
        # Only hit when the element count is not already lane/sublane aligned;
        # pad value is irrelevant because the tail is masked in-kernel.
        yhat_flat = jnp.pad(yhat_flat, (0, padded - n))
        y_flat = jnp.pad(y_flat, (0, padded - n))

    rows = padded // LANES
    yhat2d = yhat_flat.reshape(rows, LANES)
    y2d = y_flat.reshape(rows, LANES)

    # ~1 MiB block per input for the widest dtype; multiple of `align`.
    max_itemsize = max(yhat2d.dtype.itemsize, y2d.dtype.itemsize)
    target_rows = (1 << 20) // (LANES * max_itemsize)
    target_rows = max(align, (target_rows // align) * align)
    tile_rows = min(target_rows, rows)
    num_blocks = pl.cdiv(rows, tile_rows)
    mask_needed = (padded != n) or (num_blocks * tile_rows != rows)

    kernel = functools.partial(
        _partials_kernel, beta=float(beta), eta=float(eta),
        tile_rows=tile_rows, n_valid=n, mask_needed=mask_needed)

    partials = pl.pallas_call(
        kernel,
        out_shape=jax.ShapeDtypeStruct((num_blocks, 3, LANES), jnp.float32),
        grid=(num_blocks,),
        in_specs=[
            pl.BlockSpec((tile_rows, LANES), lambda i: (i, 0)),
            pl.BlockSpec((tile_rows, LANES), lambda i: (i, 0)),
        ],
        out_specs=pl.BlockSpec((1, 3, LANES), lambda i: (i, 0, 0)),
        compiler_params=pltpu.CompilerParams(
            dimension_semantics=("parallel",)),
    )(yhat2d, y2d)

    # Tiny epilogue: combine per-block lane-wide partials and apply the F1
    # formula.  fp = sum(sig) - tp, fn = sum(y) - tp.
    sums = jnp.sum(partials, axis=(0, 2))        # (3,)
    s_sig, s_y, s_sy = sums[0], sums[1], sums[2]
    tp = s_sy
    fp = s_sig - s_sy
    fn = s_y - s_sy
    # torch.mean over a 0-dim value is the value itself.
    return 1.0 - 2.0 * tp / (2.0 * tp + fn + fp + 1e-16)


def _reference(y_hat, y, beta=1.0, eta=0.0):
    sig = jax.nn.sigmoid(beta * (y_hat.astype(jnp.float32) + eta))
    yf = y.astype(jnp.float32)
    tp = jnp.sum(sig * yf)
    fp = jnp.sum(sig * (1.0 - yf))
    fn = jnp.sum((1.0 - sig) * yf)
    return jnp.mean(1.0 - 2.0 * tp / (2.0 * tp + fn + fp + 1e-16))


if __name__ == "__main__":
    key = jax.random.PRNGKey(0)
    k1, k2 = jax.random.split(key)

    # NCHW logits and binary targets.
    y_hat = jax.random.normal(k1, (2, 4, 16, 16), dtype=jnp.float32)
    y = (jax.random.uniform(k2, (2, 4, 16, 16)) > 0.5).astype(jnp.float32)

    loss = jax.block_until_ready(global_sigmoid_f1(y_hat, y, beta=1.0, eta=0.0))
    ref = jax.block_until_ready(_reference(y_hat, y, beta=1.0, eta=0.0))

    assert jnp.allclose(loss, ref, rtol=1e-5, atol=1e-6), (loss, ref)
    print("KERNEL_OK")
</pallas_src>

<mosaic_0001>
module attributes {stable_mosaic.version = 11 : i64} {
  func.func @_partials_kernel(%arg0: i32, %arg1: memref<16x128xf32, #tpu.memory_space<vmem>>, %arg2: memref<16x128xf32, #tpu.memory_space<vmem>>, %arg3: memref<1x3x128xf32, #tpu.memory_space<vmem>>) attributes {dimension_semantics = [#tpu.dimension_semantics<parallel>], iteration_bounds = array<i64: 1>, scalar_prefetch = 0 : i64, scratch_operands = 0 : i64, tpu.core_type = #tpu.core_type<tc>, window_params = [{transform_indices = @transform_0, window_bounds = array<i64: 16, 128>}, {transform_indices = @transform_1, window_bounds = array<i64: 16, 128>}, {transform_indices = @transform_2, window_bounds = array<i64: 1, 3, 128>}]} {
    %c0 = arith.constant 0 : index
    %c0_0 = arith.constant 0 : index
    %0 = vector.load %arg1[%c0, %c0_0] : memref<16x128xf32, #tpu.memory_space<vmem>>, vector<16x128xf32>
    %c0_1 = arith.constant 0 : index
    %c0_2 = arith.constant 0 : index
    %1 = vector.load %arg2[%c0_1, %c0_2] : memref<16x128xf32, #tpu.memory_space<vmem>>, vector<16x128xf32>
    %cst = arith.constant 0.000000e+00 : f32
    %2 = vector.broadcast %cst : f32 to vector<16x128xf32>
    %3 = arith.addf %0, %2 : vector<16x128xf32>
    %cst_3 = arith.constant 1.000000e+00 : f32
    %4 = vector.broadcast %cst_3 : f32 to vector<16x128xf32>
    %5 = arith.mulf %4, %3 : vector<16x128xf32>
    %cst_4 = arith.constant 5.000000e-01 : f32
    %6 = vector.broadcast %cst_4 : f32 to vector<16x128xf32>
    %7 = arith.mulf %6, %5 : vector<16x128xf32>
    %8 = math.tanh %7 : vector<16x128xf32>
    %cst_5 = arith.constant 1.000000e+00 : f32
    %9 = vector.broadcast %cst_5 : f32 to vector<16x128xf32>
    %10 = arith.addf %8, %9 : vector<16x128xf32>
    %cst_6 = arith.constant 5.000000e-01 : f32
    %11 = vector.broadcast %cst_6 : f32 to vector<16x128xf32>
    %12 = arith.mulf %11, %10 : vector<16x128xf32>
    %cst_7 = arith.constant dense<0.000000e+00> : vector<128xf32>
    %13 = vector.multi_reduction <add>, %12, %cst_7 [0] : vector<16x128xf32> to vector<128xf32>
    %14 = vector.shape_cast %13 : vector<128xf32> to vector<1x128xf32>
    %c0_8 = arith.constant 0 : index
    %c0_9 = arith.constant 0 : index
    %c0_10 = arith.constant 0 : index
    %15 = vector.load %arg3[%c0_8, %c0_9, %c0_10] : memref<1x3x128xf32, #tpu.memory_space<vmem>>, vector<1x1x128xf32>
    %16 = vector.shape_cast %15 : vector<1x1x128xf32> to vector<1x128xf32>
    %17 = vector.shape_cast %14 : vector<1x128xf32> to vector<1x1x128xf32>
    tpu.vector_store %arg3[%c0_8, %c0_9, %c0_10], %17 {strides = array<i32>} : memref<1x3x128xf32, #tpu.memory_space<vmem>>, vector<1x1x128xf32>,
    %cst_11 = arith.constant dense<0.000000e+00> : vector<128xf32>
    %18 = vector.multi_reduction <add>, %1, %cst_11 [0] : vector<16x128xf32> to vector<128xf32>
    %19 = vector.shape_cast %18 : vector<128xf32> to vector<1x128xf32>
    %c0_12 = arith.constant 0 : index
    %c1 = arith.constant 1 : index
    %c0_13 = arith.constant 0 : index
    %20 = vector.load %arg3[%c0_12, %c1, %c0_13] : memref<1x3x128xf32, #tpu.memory_space<vmem>>, vector<1x1x128xf32>
    %21 = vector.shape_cast %20 : vector<1x1x128xf32> to vector<1x128xf32>
    %22 = vector.shape_cast %19 : vector<1x128xf32> to vector<1x1x128xf32>
    tpu.vector_store %arg3[%c0_12, %c1, %c0_13], %22 {strides = array<i32>} : memref<1x3x128xf32, #tpu.memory_space<vmem>>, vector<1x1x128xf32>,
    %23 = arith.mulf %12, %1 : vector<16x128xf32>
    %cst_14 = arith.constant dense<0.000000e+00> : vector<128xf32>
    %24 = vector.multi_reduction <add>, %23, %cst_14 [0] : vector<16x128xf32> to vector<128xf32>
    %25 = vector.shape_cast %24 : vector<128xf32> to vector<1x128xf32>
    %c0_15 = arith.constant 0 : index
    %c2 = arith.constant 2 : index
    %c0_16 = arith.constant 0 : index
    %26 = vector.load %arg3[%c0_15, %c2, %c0_16] : memref<1x3x128xf32, #tpu.memory_space<vmem>>, vector<1x1x128xf32>
    %27 = vector.shape_cast %26 : vector<1x1x128xf32> to vector<1x128xf32>
    %28 = vector.shape_cast %25 : vector<1x128xf32> to vector<1x1x128xf32>
    tpu.vector_store %arg3[%c0_15, %c2, %c0_16], %28 {strides = array<i32>} : memref<1x3x128xf32, #tpu.memory_space<vmem>>, vector<1x1x128xf32>,
    return
  }
  func.func @transform_0(%arg0: i32) -> (i32, i32) {
    %c0_i32 = arith.constant 0 : i32
    %c0_i32_0 = arith.constant 0 : i32
    return %arg0, %c0_i32 : i32, i32
  }
  func.func @transform_1(%arg0: i32) -> (i32, i32) {
    %c0_i32 = arith.constant 0 : i32
    %c0_i32_0 = arith.constant 0 : i32
    return %arg0, %c0_i32 : i32, i32
  }
  func.func @transform_2(%arg0: i32) -> (i32, i32, i32) {
    %c0_i32 = arith.constant 0 : i32
    %c0_i32_0 = arith.constant 0 : i32
    %c0_i32_1 = arith.constant 0 : i32
    return %arg0, %c0_i32, %c0_i32_0 : i32, i32, i32
  }
}

</mosaic_0001>

<bundles_post_ra>
// kernel: tpu_custom_call.1
= control target key start
LH: loop header
LB: loop body
LE: loop exit
PB: predicated region body
PF: predicated region fallthrough
CT: control target
= control target key end

     0   :  { %7 = vsyncpa [#allocation3], 0  ;;  %s183_s0 = inlined_call_operand.hbm [shape: f32[16,128], index: 0, kind: input, shape index: {}]   ;;  %s184_s1 = inlined_call_operand.hbm [shape: f32[16,128], index: 1, kind: input, shape index: {}]   ;;  %s185_s2 = inlined_call_operand.vmem [shape: f32[1,3,128], index: 2, kind: output, shape index: {}]  }
   0x1   :  { %s13_s11 = sshll.u32 %s183_s0, 4  ;;  %s14_s11 = int_to_ptr.hbm [resolvable:$true] %s13_s11 }
   0x2   :  { %8 = vsyncpa [#allocation5], 0  ;;  %s149_s12 = smov [#allocation2]   ;;  %s26_s16 = sshll.u32 %s184_s1, 4  ;;  %s27_s16 = int_to_ptr.hbm [resolvable:$true] %s26_s16 }
   0x3   :  { %s15_s13 = sshll.u32 %s149_s12, 4  ;;  %s150_s17 = smov 128   ;;  %s16_s13 = int_to_ptr.vmem [resolvable:$true] %s15_s13 }
   0x4   :  { %s151_s18 = smov 8   ;;  %s152_s19 = smov [#allocation4]  }
   0x5   :  { %21 = dma.hbm_to_vmem [thread:$0]  %s14_s11, 256, %s16_s13, [#allocation3], %s150_s17, %s150_s17, %s151_s18  }
   0x6   :  { %s28_s20 = sshll.u32 %s152_s19, 4  ;;  %s29_s20 = int_to_ptr.vmem [resolvable:$true] %s28_s20 }
   0x7   :  { %34 = dma.hbm_to_vmem [thread:$0]  %s27_s16, 256, %s29_s20, [#allocation5], %s150_s17, %s150_s17, %s151_s18  }
   0x8   :  { %145 = dma.done.wait [#allocation3], 256  }
   0x9   :  { %146 = vsyncadd [#allocation3], 4294967040 }
   0xa   :  { %147 = dma.done.wait [#allocation5], 256  }
   0xb   :  { %148 = vsyncadd [#allocation5], 4294967040  ;;  %v43_v0 = vld [vmem:[#allocation2] sm:$0xff]  ;;  %v44_v1 = vld [vmem:[#allocation2 + $0x8] sm:$0xff] }
   0xc   :  { %v49_v2 = vmul.f32 0.5, %v43_v0  ;;  %v50_v3 = vmul.f32 0.5, %v44_v1  ;;  %v45_v4 = vld [vmem:[#allocation4] sm:$0xff]  ;;  %v46_v5 = vld [vmem:[#allocation4 + $0x8] sm:$0xff] }
   0xd   :  { %v65_v6 = vadd.f32 %v46_v5, %v45_v4 }
   0xe   :  { %93 = vtanh.f32 %v49_v2 }
   0xf   :  { %95 = vtanh.f32 %v50_v3  ;;  %v66_v7 = vrot.slane %v65_v6, 4 }
  0x11   :  { %v67_v8 = vadd.f32 %v66_v7, %v65_v6 }
  0x13   :  { %v68_v9 = vrot.slane %v67_v8, 2 }
  0x14   :  { %v94_v10 = vpop.eup %93 }
  0x15   :  { %v96_v11 = vpop.eup %95  ;;  %v53_v12 = vadd.f32 1.0, %v94_v10  ;;  %v69_v13 = vadd.f32 %v68_v9, %v67_v8 }
  0x16   :  { %v54_v14 = vadd.f32 1.0, %v96_v11 }
  0x17   :  { %v55_v15 = vmul.f32 0.5, %v53_v12  ;;  %v70_v16 = vrot.slane %v69_v13, 1 }
  0x18   :  { %v56_v17 = vmul.f32 0.5, %v54_v14 }
  0x19   :  { %v71_v18 = vadd.f32 %v70_v16, %v69_v13  ;;  %v73_v19 = vmul.f32 %v55_v15, %v45_v4 }
  0x1a   :  { %v57_v20 = vadd.f32 %v56_v17, %v55_v15  ;;  %v74_v21 = vmul.f32 %v56_v17, %v46_v5 }
  0x1b   :  { %72 = vst [vmem:[%s185_s2 + $0x1] sm:$0x1] %v71_v18 }
  0x1c   :  { %v58_v22 = vrot.slane %v57_v20, 4  ;;  %v75_v23 = vadd.f32 %v74_v21, %v73_v19 }
  0x1e   :  { %v59_v24 = vadd.f32 %v58_v22, %v57_v20  ;;  %v76_v25 = vrot.slane %v75_v23, 4 }
  0x20   :  { %v60_v26 = vrot.slane %v59_v24, 2  ;;  %v77_v27 = vadd.f32 %v76_v25, %v75_v23 }
  0x22   :  { %v61_v28 = vadd.f32 %v60_v26, %v59_v24  ;;  %v78_v29 = vrot.slane %v77_v27, 2 }
  0x24   :  { %v62_v30 = vrot.slane %v61_v28, 1  ;;  %v79_v31 = vadd.f32 %v78_v29, %v77_v27 }
  0x26   :  { %v63_v32 = vadd.f32 %v62_v30, %v61_v28  ;;  %v80_v33 = vrot.slane %v79_v31, 1 }
  0x28   :  { %64 = vst [vmem:[%s185_s2] sm:$0x1] %v63_v32  ;;  %v81_v34 = vadd.f32 %v80_v33, %v79_v31 }
  0x2a   :  { %82 = vst [vmem:[%s185_s2 + $0x2] sm:$0x1] %v81_v34 }
  0x2b   :  { %87 = vsyncpa [#allocation3], 1 }
  0x2c   :  { %88 = vsyncpa [#allocation5], 1 }

</bundles_post_ra>
